<compile_context>
chip_gen: v7x
topology: tpu7x:2x2x1
jax: 0.10.0
libtpu: 0.0.40
codegen_flags: <defaults>
</compile_context>

<pallas_src>
import math

import jax
import jax.numpy as jnp
from jax.experimental import pallas as pl
from jax.experimental.pallas import tpu as pltpu


def _round_up(n, m):
    return (n + m - 1) // m * m


# ----------------------------------------------------------------------------
# Kernel: one grid step = one output row-pair (2i, 2i+1) of one image.
#
#   xc_ref: (W+2, Kp)   bf16   padded input row i    (x[i,  :] with L/R halo)
#   xp_ref: (W+2, Kp)   bf16   padded input row i-1  (x[i-1,:] with L/R halo)
#   w_ref : (9, Kp, Cp) bf16   kernel taps, index ky*3+kx   (VMEM-resident)
#   b_ref : (1, Cp)     f32    bias                         (VMEM-resident)
#   o_ref : (2, 2, W+1, Cp) bf16   parity-major output (ry, rx, j, c)
#
# Output-parity decomposition of ConvTranspose2d(k=3, s=2, p=0):
#   out[2i  ,2j  ] = x[i,j]W00 + x[i,j-1]W02 + x[i-1,j]W20 + x[i-1,j-1]W22
#   out[2i  ,2j+1] = x[i,j]W01 + x[i-1,j]W21
#   out[2i+1,2j  ] = x[i,j]W10 + x[i,j-1]W12
#   out[2i+1,2j+1] = x[i,j]W11
# ----------------------------------------------------------------------------
def _upconv_row_kernel(xc_ref, xp_ref, w_ref, b_ref, o_ref):
    wp1 = o_ref.shape[2]                       # W + 1 output columns
    a = xc_ref[pl.ds(1, wp1), :]               # x[i  , j  ]
    bcol = xc_ref[pl.ds(0, wp1), :]            # x[i  , j-1]
    c = xp_ref[pl.ds(1, wp1), :]               # x[i-1, j  ]
    d = xp_ref[pl.ds(0, wp1), :]               # x[i-1, j-1]
    bias = b_ref[...]                          # (1, Cp) f32

    def mm(xrow, ky, kx):                      # (W+1,Kp) @ (Kp,Cp) -> f32
        return jnp.dot(xrow, w_ref[ky * 3 + kx],
                       preferred_element_type=jnp.float32)

    ee = mm(a, 0, 0) + mm(bcol, 0, 2) + mm(c, 2, 0) + mm(d, 2, 2)
    eo = mm(a, 0, 1) + mm(c, 2, 1)
    oe = mm(a, 1, 0) + mm(bcol, 1, 2)
    oo = mm(a, 1, 1)

    def epilogue(v):                           # fused bias + ReLU, bf16 store
        return jnp.maximum(v + bias, 0.0).astype(o_ref.dtype)

    o_ref[0, 0] = epilogue(ee)
    o_ref[0, 1] = epilogue(eo)
    o_ref[1, 0] = epilogue(oe)
    o_ref[1, 1] = epilogue(oo)


# ----------------------------------------------------------------------------
# VMEM budget: derived from the actual tile working set, capped per chip.
# ----------------------------------------------------------------------------
def _vmem_limit_bytes(wp2, wp1, kp, cp):
    bf16 = 2
    ws = (2 * 2 * wp2 * kp * bf16            # two input-row views, double-buffered
          + 2 * 9 * kp * cp * bf16           # resident weight taps (+ spare buffer)
          + 2 * cp * 4                       # bias
          + 2 * (2 * 2 * wp1 * cp) * bf16)   # parity-major output block, dbl-buffered
    limit = max(32 * 1024 * 1024, 4 * ws)
    try:
        cap = pltpu.get_tpu_info().vmem_capacity_bytes   # 64 MiB v7x, 128 MiB v5e/v6e
        limit = min(limit, (cap * 3) // 4)
    except Exception:
        limit = min(limit, 96 * 1024 * 1024)
    return int(limit)


# ----------------------------------------------------------------------------
# UpConv forward, NHWC native:  relu(ConvTranspose2d(k=3, s=2, p=0)(x))
# ----------------------------------------------------------------------------
def upconv_forward_nhwc(params, x_nhwc, out_dtype=None):
    w = params['w']                        # (Cin, Cout, 3, 3) PyTorch ConvTranspose2d layout
    b = params['b']                        # (Cout,)
    assert w.shape[2:] == (3, 3), "specialised to filter_size=3, stride=2"

    n, h, wd, cin = x_nhwc.shape
    cout = w.shape[1]
    out_dtype = x_nhwc.dtype if out_dtype is None else out_dtype

    kp = _round_up(cin, 16)                # bf16 sublane pack
    cp = _round_up(cout, 128)              # lane-dense (unmasked) stores
    hp1, wp1, wp2 = h + 1, wd + 1, wd + 2

    # ONE zero-padded bf16 copy of the activation (+1 halo row/col each side,
    # channels padded to Kp).  Replaces the old ~9x shifted-copy patch build.
    xpad = jnp.pad(x_nhwc.astype(jnp.bfloat16),
                   ((0, 0), (1, 1), (1, 1), (0, kp - cin)))      # (n, H+2, W+2, Kp)

    # All 9 taps as (ky*3+kx, Kp, Cp) bf16; bias as (1, Cp) f32.
    w_taps = jnp.transpose(w, (2, 3, 0, 1)).reshape(9, cin, cout)
    w_taps = jnp.pad(w_taps, ((0, 0), (0, kp - cin), (0, cp - cout))
                     ).astype(jnp.bfloat16)
    bias = jnp.pad(b, (0, cp - cout)).astype(jnp.float32).reshape(1, cp)

    y = pl.pallas_call(
        _upconv_row_kernel,
        out_shape=jax.ShapeDtypeStruct((n, hp1, 2, 2, wp1, cp), jnp.bfloat16),
        grid_spec=pltpu.PrefetchScalarGridSpec(
            num_scalar_prefetch=0,
            grid=(n, hp1),
            in_specs=[
                # current input row  (x[i]   lives at padded row i+1)
                pl.BlockSpec((None, None, wp2, kp), lambda nb, i: (nb, i + 1, 0, 0)),
                # previous input row (x[i-1] lives at padded row i)
                pl.BlockSpec((None, None, wp2, kp), lambda nb, i: (nb, i, 0, 0)),
                # weights / bias: constant index_map -> fetched once, stays resident
                pl.BlockSpec((9, kp, cp), lambda nb, i: (0, 0, 0)),
                pl.BlockSpec((1, cp), lambda nb, i: (0, 0)),
            ],
            out_specs=pl.BlockSpec((None, None, 2, 2, wp1, cp),
                                   lambda nb, i: (nb, i, 0, 0, 0, 0)),
        ),
        compiler_params=pltpu.CompilerParams(
            dimension_semantics=("parallel", "parallel"),
            vmem_limit_bytes=_vmem_limit_bytes(wp2, wp1, kp, cp)),
    )(xpad, xpad, w_taps, bias)

    # Single fused assembly pass: (n, i, ry, rx, j, c) -> (n, 2i+ry, 2j+rx, c),
    # drop spatial/channel padding, cast to the caller dtype.
    y = jnp.transpose(y, (0, 1, 2, 4, 3, 5))           # (n, i, ry, j, rx, c)
    y = y.reshape(n, 2 * hp1, 2 * wp1, cp)
    return y[:, :2 * h + 1, :2 * wd + 1, :cout].astype(out_dtype)


def upconv_forward(params, x_nchw):
    """PyTorch-boundary wrapper: NCHW in / NCHW out (transpose only here)."""
    x = jnp.transpose(x_nchw, (0, 2, 3, 1))            # NCHW -> NHWC
    y = upconv_forward_nhwc(params, x, out_dtype=x_nchw.dtype)
    return jnp.transpose(y, (0, 3, 1, 2))              # NHWC -> NCHW


# ----------------------------------------------------------------------------
# Pure-XLA reference (gradient-of-conv identity) for an in-script check.
# ----------------------------------------------------------------------------
def upconv_reference(params, x_nchw):
    w = params['w']
    b = params['b']
    x = jnp.transpose(x_nchw, (0, 2, 3, 1))
    rhs = jnp.transpose(w[:, :, ::-1, ::-1], (2, 3, 0, 1))   # flip -> (kh, kw, Cin, Cout)
    y = jax.lax.conv_general_dilated(
        x, rhs, window_strides=(1, 1), padding=((2, 2), (2, 2)),
        lhs_dilation=(2, 2),
        dimension_numbers=('NHWC', 'HWIO', 'NHWC'),
        precision=jax.lax.Precision.HIGHEST)
    y = jnp.maximum(y + b, 0.0)
    return jnp.transpose(y, (0, 3, 1, 2))


# ----------------------------------------------------------------------------
# Deterministic parameter initialization
# ----------------------------------------------------------------------------
def init_params(key, in_channels, out_channels, filter_size=3):
    kw, kb = jax.random.split(key)
    fan = in_channels * filter_size * filter_size
    w = jax.random.normal(kw, (in_channels, out_channels, filter_size, filter_size),
                          jnp.float32) / math.sqrt(fan)
    b = 0.01 * jax.random.normal(kb, (out_channels,), jnp.float32)
    # TODO(synk): self.bn (BatchNorm2d) exists on the PyTorch module but is never
    # applied in UpConv.forward, so no BN parameters are created or used.
    return {'w': w, 'b': b}


# ----------------------------------------------------------------------------
if __name__ == "__main__":
    in_channels, out_channels = 4, 8
    key = jax.random.PRNGKey(0)
    pkey, xkey = jax.random.split(key)
    params = init_params(pkey, in_channels, out_channels)
    x = jax.random.normal(xkey, (2, in_channels, 16, 16), jnp.float32)

    fwd = jax.jit(upconv_forward)
    out = fwd(params, x)
    jax.block_until_ready(out)

    assert out.shape == (2, out_channels, 33, 33), out.shape
    assert out.dtype == x.dtype
    assert bool(jnp.all(jnp.isfinite(out)))
    assert bool(jnp.all(out >= 0.0))                    # ReLU output

    ref = jax.jit(upconv_reference)(params, x)
    max_err = float(jnp.max(jnp.abs(out - ref)))
    # bf16 activations/weights + bf16 kernel stores -> slightly looser bound.
    assert max_err < 7.5e-2, f"max abs error vs reference: {max_err}"

    print("KERNEL_OK")
</pallas_src>

<mosaic_0001>
module attributes {stable_mosaic.version = 11 : i64} {
  func.func @_upconv_row_kernel(%arg0: i32, %arg1: i32, %arg2: memref<1x1x18x16xbf16, #tpu.memory_space<vmem>>, %arg3: memref<1x1x18x16xbf16, #tpu.memory_space<vmem>>, %arg4: memref<9x16x128xbf16, #tpu.memory_space<vmem>>, %arg5: memref<1x128xf32, #tpu.memory_space<vmem>>, %arg6: memref<1x1x2x2x17x128xbf16, #tpu.memory_space<vmem>>) attributes {dimension_semantics = [#tpu.dimension_semantics<parallel>, #tpu.dimension_semantics<parallel>], iteration_bounds = array<i64: 2, 17>, scalar_prefetch = 0 : i64, scratch_operands = 0 : i64, tpu.core_type = #tpu.core_type<tc>, window_params = [{transform_indices = @transform_0, window_bounds = array<i64: 1, 1, 18, 16>}, {transform_indices = @transform_1, window_bounds = array<i64: 1, 1, 18, 16>}, {pipeline_mode = #tpu.pipeline_mode<synchronous>, transform_indices = @transform_2, window_bounds = array<i64: 9, 16, 128>}, {pipeline_mode = #tpu.pipeline_mode<synchronous>, transform_indices = @transform_3, window_bounds = array<i64: 1, 128>}, {transform_indices = @transform_4, window_bounds = array<i64: 1, 1, 2, 2, 17, 128>}]} {
    %c0 = arith.constant 0 : index
    %c0_0 = arith.constant 0 : index
    %c1 = arith.constant 1 : index
    %c0_1 = arith.constant 0 : index
    %0 = vector.load %arg2[%c0, %c0_0, %c1, %c0_1] : memref<1x1x18x16xbf16, #tpu.memory_space<vmem>>, vector<1x1x17x16xbf16>
    %1 = vector.shape_cast %0 : vector<1x1x17x16xbf16> to vector<17x16xbf16>
    %c0_2 = arith.constant 0 : index
    %c0_3 = arith.constant 0 : index
    %c0_4 = arith.constant 0 : index
    %c0_5 = arith.constant 0 : index
    %2 = vector.load %arg2[%c0_2, %c0_3, %c0_4, %c0_5] : memref<1x1x18x16xbf16, #tpu.memory_space<vmem>>, vector<1x1x17x16xbf16>
    %3 = vector.shape_cast %2 : vector<1x1x17x16xbf16> to vector<17x16xbf16>
    %c0_6 = arith.constant 0 : index
    %c0_7 = arith.constant 0 : index
    %c1_8 = arith.constant 1 : index
    %c0_9 = arith.constant 0 : index
    %4 = vector.load %arg3[%c0_6, %c0_7, %c1_8, %c0_9] : memref<1x1x18x16xbf16, #tpu.memory_space<vmem>>, vector<1x1x17x16xbf16>
    %5 = vector.shape_cast %4 : vector<1x1x17x16xbf16> to vector<17x16xbf16>
    %c0_10 = arith.constant 0 : index
    %c0_11 = arith.constant 0 : index
    %c0_12 = arith.constant 0 : index
    %c0_13 = arith.constant 0 : index
    %6 = vector.load %arg3[%c0_10, %c0_11, %c0_12, %c0_13] : memref<1x1x18x16xbf16, #tpu.memory_space<vmem>>, vector<1x1x17x16xbf16>
    %7 = vector.shape_cast %6 : vector<1x1x17x16xbf16> to vector<17x16xbf16>
    %c0_14 = arith.constant 0 : index
    %c0_15 = arith.constant 0 : index
    %8 = vector.load %arg5[%c0_14, %c0_15] : memref<1x128xf32, #tpu.memory_space<vmem>>, vector<1x128xf32>
    %c0_16 = arith.constant 0 : index
    %c0_17 = arith.constant 0 : index
    %c0_18 = arith.constant 0 : index
    %9 = vector.load %arg4[%c0_16, %c0_17, %c0_18] : memref<9x16x128xbf16, #tpu.memory_space<vmem>>, vector<1x16x128xbf16>
    %10 = vector.shape_cast %9 : vector<1x16x128xbf16> to vector<16x128xbf16>
    %cst = arith.constant dense<0.000000e+00> : vector<17x128xf32>
    %11 = tpu.matmul %1, %10, %cst {dimension_numbers = #tpu.dot_dimension_numbers<[1], [0], [0], [1], [0, 0, 1, 1], [], []>} : vector<17x16xbf16>, vector<16x128xbf16>, vector<17x128xf32> -> vector<17x128xf32>
    %c2 = arith.constant 2 : index
    %c0_19 = arith.constant 0 : index
    %c0_20 = arith.constant 0 : index
    %12 = vector.load %arg4[%c2, %c0_19, %c0_20] : memref<9x16x128xbf16, #tpu.memory_space<vmem>>, vector<1x16x128xbf16>
    %13 = vector.shape_cast %12 : vector<1x16x128xbf16> to vector<16x128xbf16>
    %cst_21 = arith.constant dense<0.000000e+00> : vector<17x128xf32>
    %14 = tpu.matmul %3, %13, %cst_21 {dimension_numbers = #tpu.dot_dimension_numbers<[1], [0], [0], [1], [0, 0, 1, 1], [], []>} : vector<17x16xbf16>, vector<16x128xbf16>, vector<17x128xf32> -> vector<17x128xf32>
    %15 = arith.addf %11, %14 : vector<17x128xf32>
    %c6 = arith.constant 6 : index
    %c0_22 = arith.constant 0 : index
    %c0_23 = arith.constant 0 : index
    %16 = vector.load %arg4[%c6, %c0_22, %c0_23] : memref<9x16x128xbf16, #tpu.memory_space<vmem>>, vector<1x16x128xbf16>
    %17 = vector.shape_cast %16 : vector<1x16x128xbf16> to vector<16x128xbf16>
    %cst_24 = arith.constant dense<0.000000e+00> : vector<17x128xf32>
    %18 = tpu.matmul %5, %17, %cst_24 {dimension_numbers = #tpu.dot_dimension_numbers<[1], [0], [0], [1], [0, 0, 1, 1], [], []>} : vector<17x16xbf16>, vector<16x128xbf16>, vector<17x128xf32> -> vector<17x128xf32>
    %19 = arith.addf %15, %18 : vector<17x128xf32>
    %c8 = arith.constant 8 : index
    %c0_25 = arith.constant 0 : index
    %c0_26 = arith.constant 0 : index
    %20 = vector.load %arg4[%c8, %c0_25, %c0_26] : memref<9x16x128xbf16, #tpu.memory_space<vmem>>, vector<1x16x128xbf16>
    %21 = vector.shape_cast %20 : vector<1x16x128xbf16> to vector<16x128xbf16>
    %cst_27 = arith.constant dense<0.000000e+00> : vector<17x128xf32>
    %22 = tpu.matmul %7, %21, %cst_27 {dimension_numbers = #tpu.dot_dimension_numbers<[1], [0], [0], [1], [0, 0, 1, 1], [], []>} : vector<17x16xbf16>, vector<16x128xbf16>, vector<17x128xf32> -> vector<17x128xf32>
    %23 = arith.addf %19, %22 : vector<17x128xf32>
    %c1_28 = arith.constant 1 : index
    %c0_29 = arith.constant 0 : index
    %c0_30 = arith.constant 0 : index
    %24 = vector.load %arg4[%c1_28, %c0_29, %c0_30] : memref<9x16x128xbf16, #tpu.memory_space<vmem>>, vector<1x16x128xbf16>
    %25 = vector.shape_cast %24 : vector<1x16x128xbf16> to vector<16x128xbf16>
    %cst_31 = arith.constant dense<0.000000e+00> : vector<17x128xf32>
    %26 = tpu.matmul %1, %25, %cst_31 {dimension_numbers = #tpu.dot_dimension_numbers<[1], [0], [0], [1], [0, 0, 1, 1], [], []>} : vector<17x16xbf16>, vector<16x128xbf16>, vector<17x128xf32> -> vector<17x128xf32>
    %c7 = arith.constant 7 : index
    %c0_32 = arith.constant 0 : index
    %c0_33 = arith.constant 0 : index
    %27 = vector.load %arg4[%c7, %c0_32, %c0_33] : memref<9x16x128xbf16, #tpu.memory_space<vmem>>, vector<1x16x128xbf16>
    %28 = vector.shape_cast %27 : vector<1x16x128xbf16> to vector<16x128xbf16>
    %cst_34 = arith.constant dense<0.000000e+00> : vector<17x128xf32>
    %29 = tpu.matmul %5, %28, %cst_34 {dimension_numbers = #tpu.dot_dimension_numbers<[1], [0], [0], [1], [0, 0, 1, 1], [], []>} : vector<17x16xbf16>, vector<16x128xbf16>, vector<17x128xf32> -> vector<17x128xf32>
    %30 = arith.addf %26, %29 : vector<17x128xf32>
    %c3 = arith.constant 3 : index
    %c0_35 = arith.constant 0 : index
    %c0_36 = arith.constant 0 : index
    %31 = vector.load %arg4[%c3, %c0_35, %c0_36] : memref<9x16x128xbf16, #tpu.memory_space<vmem>>, vector<1x16x128xbf16>
    %32 = vector.shape_cast %31 : vector<1x16x128xbf16> to vector<16x128xbf16>
    %cst_37 = arith.constant dense<0.000000e+00> : vector<17x128xf32>
    %33 = tpu.matmul %1, %32, %cst_37 {dimension_numbers = #tpu.dot_dimension_numbers<[1], [0], [0], [1], [0, 0, 1, 1], [], []>} : vector<17x16xbf16>, vector<16x128xbf16>, vector<17x128xf32> -> vector<17x128xf32>
    %c5 = arith.constant 5 : index
    %c0_38 = arith.constant 0 : index
    %c0_39 = arith.constant 0 : index
    %34 = vector.load %arg4[%c5, %c0_38, %c0_39] : memref<9x16x128xbf16, #tpu.memory_space<vmem>>, vector<1x16x128xbf16>
    %35 = vector.shape_cast %34 : vector<1x16x128xbf16> to vector<16x128xbf16>
    %cst_40 = arith.constant dense<0.000000e+00> : vector<17x128xf32>
    %36 = tpu.matmul %3, %35, %cst_40 {dimension_numbers = #tpu.dot_dimension_numbers<[1], [0], [0], [1], [0, 0, 1, 1], [], []>} : vector<17x16xbf16>, vector<16x128xbf16>, vector<17x128xf32> -> vector<17x128xf32>
    %37 = arith.addf %33, %36 : vector<17x128xf32>
    %c4 = arith.constant 4 : index
    %c0_41 = arith.constant 0 : index
    %c0_42 = arith.constant 0 : index
    %38 = vector.load %arg4[%c4, %c0_41, %c0_42] : memref<9x16x128xbf16, #tpu.memory_space<vmem>>, vector<1x16x128xbf16>
    %39 = vector.shape_cast %38 : vector<1x16x128xbf16> to vector<16x128xbf16>
    %cst_43 = arith.constant dense<0.000000e+00> : vector<17x128xf32>
    %40 = tpu.matmul %1, %39, %cst_43 {dimension_numbers = #tpu.dot_dimension_numbers<[1], [0], [0], [1], [0, 0, 1, 1], [], []>} : vector<17x16xbf16>, vector<16x128xbf16>, vector<17x128xf32> -> vector<17x128xf32>
    %41 = vector.broadcast %8 : vector<1x128xf32> to vector<17x128xf32>
    %42 = arith.addf %23, %41 : vector<17x128xf32>
    %cst_44 = arith.constant 0.000000e+00 : f32
    %43 = vector.broadcast %cst_44 : f32 to vector<17x128xf32>
    %44 = arith.maximumf %42, %43 : vector<17x128xf32>
    %45 = arith.truncf %44 : vector<17x128xf32> to vector<17x128xbf16>
    %c0_45 = arith.constant 0 : index
    %c0_46 = arith.constant 0 : index
    %c0_47 = arith.constant 0 : index
    %c0_48 = arith.constant 0 : index
    %c0_49 = arith.constant 0 : index
    %c0_50 = arith.constant 0 : index
    %46 = vector.load %arg6[%c0_45, %c0_46, %c0_47, %c0_48, %c0_49, %c0_50] : memref<1x1x2x2x17x128xbf16, #tpu.memory_space<vmem>>, vector<1x1x1x1x17x128xbf16>
    %47 = vector.shape_cast %46 : vector<1x1x1x1x17x128xbf16> to vector<17x128xbf16>
    %48 = vector.shape_cast %45 : vector<17x128xbf16> to vector<1x1x1x1x17x128xbf16>
    tpu.vector_store %arg6[%c0_45, %c0_46, %c0_47, %c0_48, %c0_49, %c0_50], %48 {strides = array<i32>} : memref<1x1x2x2x17x128xbf16, #tpu.memory_space<vmem>>, vector<1x1x1x1x17x128xbf16>,
    %49 = vector.broadcast %8 : vector<1x128xf32> to vector<17x128xf32>
    %50 = arith.addf %30, %49 : vector<17x128xf32>
    %cst_51 = arith.constant 0.000000e+00 : f32
    %51 = vector.broadcast %cst_51 : f32 to vector<17x128xf32>
    %52 = arith.maximumf %50, %51 : vector<17x128xf32>
    %53 = arith.truncf %52 : vector<17x128xf32> to vector<17x128xbf16>
    %c0_52 = arith.constant 0 : index
    %c0_53 = arith.constant 0 : index
    %c0_54 = arith.constant 0 : index
    %c1_55 = arith.constant 1 : index
    %c0_56 = arith.constant 0 : index
    %c0_57 = arith.constant 0 : index
    %54 = vector.load %arg6[%c0_52, %c0_53, %c0_54, %c1_55, %c0_56, %c0_57] : memref<1x1x2x2x17x128xbf16, #tpu.memory_space<vmem>>, vector<1x1x1x1x17x128xbf16>
    %55 = vector.shape_cast %54 : vector<1x1x1x1x17x128xbf16> to vector<17x128xbf16>
    %56 = vector.shape_cast %53 : vector<17x128xbf16> to vector<1x1x1x1x17x128xbf16>
    tpu.vector_store %arg6[%c0_52, %c0_53, %c0_54, %c1_55, %c0_56, %c0_57], %56 {strides = array<i32>} : memref<1x1x2x2x17x128xbf16, #tpu.memory_space<vmem>>, vector<1x1x1x1x17x128xbf16>,
    %57 = vector.broadcast %8 : vector<1x128xf32> to vector<17x128xf32>
    %58 = arith.addf %37, %57 : vector<17x128xf32>
    %cst_58 = arith.constant 0.000000e+00 : f32
    %59 = vector.broadcast %cst_58 : f32 to vector<17x128xf32>
    %60 = arith.maximumf %58, %59 : vector<17x128xf32>
    %61 = arith.truncf %60 : vector<17x128xf32> to vector<17x128xbf16>
    %c0_59 = arith.constant 0 : index
    %c0_60 = arith.constant 0 : index
    %c1_61 = arith.constant 1 : index
    %c0_62 = arith.constant 0 : index
    %c0_63 = arith.constant 0 : index
    %c0_64 = arith.constant 0 : index
    %62 = vector.load %arg6[%c0_59, %c0_60, %c1_61, %c0_62, %c0_63, %c0_64] : memref<1x1x2x2x17x128xbf16, #tpu.memory_space<vmem>>, vector<1x1x1x1x17x128xbf16>
    %63 = vector.shape_cast %62 : vector<1x1x1x1x17x128xbf16> to vector<17x128xbf16>
    %64 = vector.shape_cast %61 : vector<17x128xbf16> to vector<1x1x1x1x17x128xbf16>
    tpu.vector_store %arg6[%c0_59, %c0_60, %c1_61, %c0_62, %c0_63, %c0_64], %64 {strides = array<i32>} : memref<1x1x2x2x17x128xbf16, #tpu.memory_space<vmem>>, vector<1x1x1x1x17x128xbf16>,
    %65 = vector.broadcast %8 : vector<1x128xf32> to vector<17x128xf32>
    %66 = arith.addf %40, %65 : vector<17x128xf32>
    %cst_65 = arith.constant 0.000000e+00 : f32
    %67 = vector.broadcast %cst_65 : f32 to vector<17x128xf32>
    %68 = arith.maximumf %66, %67 : vector<17x128xf32>
    %69 = arith.truncf %68 : vector<17x128xf32> to vector<17x128xbf16>
    %c0_66 = arith.constant 0 : index
    %c0_67 = arith.constant 0 : index
    %c1_68 = arith.constant 1 : index
    %c1_69 = arith.constant 1 : index
    %c0_70 = arith.constant 0 : index
    %c0_71 = arith.constant 0 : index
    %70 = vector.load %arg6[%c0_66, %c0_67, %c1_68, %c1_69, %c0_70, %c0_71] : memref<1x1x2x2x17x128xbf16, #tpu.memory_space<vmem>>, vector<1x1x1x1x17x128xbf16>
    %71 = vector.shape_cast %70 : vector<1x1x1x1x17x128xbf16> to vector<17x128xbf16>
    %72 = vector.shape_cast %69 : vector<17x128xbf16> to vector<1x1x1x1x17x128xbf16>
    tpu.vector_store %arg6[%c0_66, %c0_67, %c1_68, %c1_69, %c0_70, %c0_71], %72 {strides = array<i32>} : memref<1x1x2x2x17x128xbf16, #tpu.memory_space<vmem>>, vector<1x1x1x1x17x128xbf16>,
    return
  }
  func.func @transform_0(%arg0: i32, %arg1: i32) -> (i32, i32, i32, i32) {
    %c1_i32 = arith.constant 1 : i32
    %0 = arith.addi %arg1, %c1_i32 : i32
    %c0_i32 = arith.constant 0 : i32
    %c0_i32_0 = arith.constant 0 : i32
    %c0_i32_1 = arith.constant 0 : i32
    return %arg0, %0, %c0_i32, %c0_i32_0 : i32, i32, i32, i32
  }
  func.func @transform_1(%arg0: i32, %arg1: i32) -> (i32, i32, i32, i32) {
    %c0_i32 = arith.constant 0 : i32
    %c0_i32_0 = arith.constant 0 : i32
    %c0_i32_1 = arith.constant 0 : i32
    return %arg0, %arg1, %c0_i32, %c0_i32_0 : i32, i32, i32, i32
  }
  func.func @transform_2(%arg0: i32, %arg1: i32) -> (i32, i32, i32) {
    %c0_i32 = arith.constant 0 : i32
    %c0_i32_0 = arith.constant 0 : i32
    %c0_i32_1 = arith.constant 0 : i32
    %c0_i32_2 = arith.constant 0 : i32
    return %c0_i32, %c0_i32_0, %c0_i32_1 : i32, i32, i32
  }
  func.func @transform_3(%arg0: i32, %arg1: i32) -> (i32, i32) {
    %c0_i32 = arith.constant 0 : i32
    %c0_i32_0 = arith.constant 0 : i32
    %c0_i32_1 = arith.constant 0 : i32
    return %c0_i32, %c0_i32_0 : i32, i32
  }
  func.func @transform_4(%arg0: i32, %arg1: i32) -> (i32, i32, i32, i32, i32, i32) {
    %c0_i32 = arith.constant 0 : i32
    %c0_i32_0 = arith.constant 0 : i32
    %c0_i32_1 = arith.constant 0 : i32
    %c0_i32_2 = arith.constant 0 : i32
    %c0_i32_3 = arith.constant 0 : i32
    return %arg0, %arg1, %c0_i32, %c0_i32_0, %c0_i32_1, %c0_i32_2 : i32, i32, i32, i32, i32, i32
  }
}

</mosaic_0001>

<bundles_post_ra>
// kernel: upconv_forward.1
= control target key start
LH: loop header
LB: loop body
LE: loop exit
PB: predicated region body
PF: predicated region fallthrough
CT: control target
= control target key end

     0   :  { %s1397_s15 = smov 0   ;;  %s1399_s16 = smov 0   ;;  %s1554_s0 = inlined_call_operand.vmem [shape: bf16[2,18,18,16], index: 0, kind: input, shape index: {}, may-alias: {0,1}]   ;;  %s1555_s1 = inlined_call_operand.vmem [shape: bf16[2,18,18,16], index: 1, kind: input, shape index: {}, may-alias: {0,1}]   ;;  %s1556_s2 = inlined_call_operand.vmem [shape: bf16[9,16,128], index: 2, kind: input, shape index: {}]   ;;  %s1557_s3 = inlined_call_operand.vmem [shape: f32[1,128], index: 3, kind: input, shape index: {}]   ;;  %s1558_s4 = inlined_call_operand.vmem [shape: bf16[2,17,2,2,17,128], index: 4, kind: output, shape index: {}]  }
   0x1   :  { %s1401_s17 = smov 0   ;;  %s1403_s18 = smov 0  }
   0x2   :  { %s1405_s19 = smov 0  }
   0x3 LB: > { %s23_s20 = sadd.s32 1, %s1362_s17  ;;  %s26_s21 = sadd.s32 1, %s1366_s18  ;;  %s1370_s19 = sphi %s1405_s19, %s14_s19   ;;  %s1366_s18 = sphi %s1403_s18, %s1564_s18   ;;  %s1362_s17 = sphi %s1401_s17, %s1563_s17   ;;  %s1358_s16 = sphi %s1399_s16, %s1562_s16   ;;  %s1354_s15 = sphi %s1397_s15, %s1561_s15  }
   0x4   : > { %p24_p0 = scmp.ge.s32.totalorder %s23_s20, 17  ;;  %p1092_p1 = scmp.ge.s32.totalorder %s1370_s19, 1 }
   0x5   : > { %p202_p2 = scmp.lt.s32.totalorder %s1370_s19, 35 }
   0x6   : > { %s1566_s20 = smov (%p24_p0, %s23_s20), 0  ;;  %s1568_s21 = smov (!%p24_p0, %s26_s21), %s1366_s18 }
   0x7   : > { %p203_p3 = pnand %p1092_p1, %p202_p2  ;;  %p28_p4 = scmp.ge.s32.totalorder %s1568_s21, 2 }
   0x8   : > { %v1319_v0 = vld [vmem:[%s1556_s2 + $0x10] sm:$0xff] (!%p203_p3)   ;;  %s246_s24 = sadd.s32 (!%p203_p3), 1, %s1354_s15  ;;  %p247_p5 = scmp.lt.s32.totalorder (!%p203_p3), %s1358_s16, 1  ;;  %v1323_v2 = vld [vmem:[%s1556_s2] sm:$0xff] (!%p203_p3)   ;;  %vm302_vm0 = vcmask (!%p203_p3), 130048   ;;  %v1327_v4 = vld [vmem:[%s1556_s2 + $0x38] sm:$0xff] (!%p203_p3)  }
   0x9   : > { %s1570_s21 = smov (%p28_p4, %s1568_s21), 0  ;;  %206 = sbr.rel (%p203_p3) target bundleno = 281 (0x119), region = 36 }
   0xa   : > { %p249_p6 = scmp.lt.s32.totalorder (!%p203_p3), %s246_s24, 17  ;;  %v1322_v1 = vld [vmem:[%s1556_s2 + $0x30] sm:$0xff] (!%p203_p3)   ;;  %1220 = vmatprep.subr.bf16.mxu0 (!%p203_p3), %v1319_v0  ;;  %p259_p7 = scmp.lt.s32.totalorder (!%p203_p3), %s1354_s15, 17  ;;  %v1324_v3 = vld [vmem:[%s1556_s2 + $0x40] sm:$0xff] (!%p203_p3)   ;;  %1226 = vmatprep.subr.bf16.mxu1 (!%p203_p3), %v1323_v2  ;;  %vm357_vm1 = vsmask.f32 (!%p203_p3), 7424 }
   0xb   : > { %1221 = vmatpush3.bf16.msra.mxu0 (!%p203_p3), %v1319_v0  ;;  %1227 = vmatpush3.bf16.msra.mxu1 (!%p203_p3), %v1323_v2  ;;  %v1328_v20 = vld [vmem:[%s1556_s2 + $0x8] sm:$0xff] (!%p203_p3)   ;;  %v1330_v27 = vld [vmem:[%s1556_s2 + $0x18] sm:$0xff] (!%p203_p3)   ;;  %v1331_v28 = vld [vmem:[%s1556_s2 + $0x20] sm:$0xff] (!%p203_p3)   ;;  %p268_p8 = scmp.lt.s32.totalorder (!%p203_p3), %s1354_s15, 16  ;;  %vm840_vm2 = vcmask (!%p203_p3), 1040384  }
   0xc   : > { %1232 = vmatprep.subr.bf16.mxu0 (!%p203_p3), %v1322_v1  ;;  %1238 = vmatprep.subr.bf16.mxu1 (!%p203_p3), %v1324_v3  ;;  %v1329_v26 = vld [vmem:[%s1556_s2 + $0x28] sm:$0xff] (!%p203_p3)   ;;  %v1494_v47 = vld [vmem:[%s1557_s3] ss:$0 sm:$0xff] (!%p203_p3)  ;;  %vm841_vm3 = vsmask.f32 (!%p203_p3), 256 }
   0xd   : > { %vm1503_vm4 = vmand (!%p203_p3), %vm840_vm2, %vm841_vm3 }
  0x10   : > { %s1572_s16 = smov (!%p247_p5, %s1358_s16), 1  ;;  %s1574_s24 = smov (!%p249_p6, %s246_s24), 17 }
  0x11   : > { %s1275_s5 = smul.u32 54, %s1572_s16 }
  0x12   : > { %s1274_s6 = smul.u32 3, %s1574_s24 }
  0x13   : > { %s260_s7 = scalar_select %p259_p7, %s1354_s15, 17 }
  0x14   : > { %s253_s8 = sadd.s32 %s1275_s5, %s1274_s6  ;;  %s1576_s15 = smov (!%p268_p8, %s1354_s15), 16 }
  0x15   : > { %s1093_s9 = sshll.u32 %s253_s8, 2  ;;  %s1276_s10 = smul.u32 3, %s260_s7 }
  0x16   : > { %s255_s13 = scalar_lea.vmem %s1554_s0, %s1093_s9  ;;  %s1277_s11 = smul.u32 12, %s1576_s15 }
  0x17   : > { %s263_s23 = sadd.s32 %s1276_s10, %s1275_s5  ;;  %v1320_v5 = vld [vmem:[%s255_s13] sm:$0xff]   ;;  %v1321_v6 = vld [vmem:[%s255_s13 + $0x8] ss:$0 sps:$4 sm:$0x11]   ;;  %s1278_s10 = smul.u32 204, %s1572_s16 }
  0x18   : > { %s1094_s25 = sshll.u32 %s263_s23, 2  ;;  %1222 = vmatprep.mubr.msk.bf16.mxu0 %vm302_vm0, %v1320_v5  ;;  %v358_v7 = vshrl.u32 %v1320_v5, 16  ;;  %v360_v8 = vshll.u32 %v1320_v5, 16  ;;  %v364_v9 = vshll.u32 %v1321_v6, 16  ;;  %v368_v14 = vshrl.u32 %v1321_v6, 16 }
  0x19   : > { %1223 = vmatmul.mubr.msk.bf16.vlgmr.msra.gmra.mrb[0].mxu0 %vm302_vm0, %v1321_v6  ;;  %s265_s27 = scalar_lea.vmem %s1555_s1, %s1094_s25  ;;  %s272_s12 = sadd.s32 %s1278_s10, %s1277_s11 }
  0x1a   : > { %1233 = vmatpush3.bf16.msra.mxu0 %v1322_v1  ;;  %v362_v10 = vrot.slane %v360_v8, 1  ;;  %v366_v11 = vrot.slane %v364_v9, 1  ;;  %v1325_v12 = vld [vmem:[%s265_s27] sm:$0xff]   ;;  %v1326_v15 = vld [vmem:[%s265_s27 + $0x8] ss:$0 sps:$4 sm:$0x11]  }
  0x1b   : > { %1244 = vmatprep.subr.bf16.mxu0 %v1327_v4  ;;  %v442_v16 = vshrl.u32 %v1325_v12, 16  ;;  %v444_v17 = vshll.u32 %v1325_v12, 16  ;;  %v449_v19 = vshll.u32 %v1326_v15, 16  ;;  %v453_v24 = vshrl.u32 %v1326_v15, 16  ;;  %s1095_s13 = sshll.u32 %s272_s12, 2 }
  0x1c   : > { %v363_v13 = vor.u32 %v362_v10, %v358_v7  ;;  %s1499_s23 = scalar_lea.vmem %s1558_s4, %s1095_s13 }
  0x1d   : > { %v446_v21 = vrot.slane %v444_v17, 1  ;;  %v451_v22 = vrot.slane %v449_v19, 1  ;;  %v843_v60 = vld [vmem:[%s1499_s23 + $0x8] sm:$0x1]  ;;  %v1149_v17 = vld [vmem:[%s1499_s23 + $0x14] sm:$0x1] }
  0x1e   : > { %v367_v18 = vsel %vm357_vm1, %v363_v13, %v366_v11 }
  0x1f   : > { %1228 = vmatprep.mubr.msk.bf16.mxu1 %vm302_vm0, %v367_v18  ;;  %v447_v23 = vor.u32 %v446_v21, %v442_v16 }
  0x20   : > { %1229 = vmatmul.mubr.msk.bf16.vlgmr.msra.gmra.mrb[0].mxu1 %vm302_vm0, %v368_v14 }
  0x21   : > { %1239 = vmatpush3.bf16.msra.mxu1 %v1324_v3  ;;  %1240 = vmatprep.mubr.msk.bf16.mxu1 %vm302_vm0, %v1325_v12  ;;  %v452_v25 = vsel %vm357_vm1, %v447_v23, %v451_v22 }
  0x22   : > { %1250 = vmatprep.subr.bf16.mxu1 %v1328_v20  ;;  %1234 = vmatprep.mubr.msk.bf16.mxu0 %vm302_vm0, %v452_v25 }
  0x23   : > { %1235 = vmatmul.mubr.msk.bf16.vlgmr.msra.gmra.mrb[4].mxu0 %vm302_vm0, %v453_v24 }
  0x24   : > { %1245 = vmatpush3.bf16.msra.mxu0 %v1327_v4  ;;  %1246 = vmatprep.mubr.msk.bf16.mxu0 %vm302_vm0, %v452_v25 }
  0x25   : > { %1256 = vmatprep.subr.bf16.mxu0 %v1329_v26 }
  0x28   : > { %1241 = vmatmul.mubr.msk.bf16.vlgmr.msra.gmra.mrb[4].mxu1 %vm302_vm0, %v1326_v15 }
  0x29   : > { %1251 = vmatpush3.bf16.msra.mxu1 %v1328_v20  ;;  %1252 = vmatprep.mubr.msk.bf16.mxu1 %vm302_vm0, %v367_v18 }
  0x2a   : > { %1262 = vmatprep.subr.bf16.mxu1 %v1330_v27 }
  0x2b   : > { %1247 = vmatmul.mubr.msk.bf16.vlgmr.msra.gmra.mrb[8].mxu0 %vm302_vm0, %v453_v24 }
  0x2c   : > { %1257 = vmatpush3.bf16.msra.mxu0 %v1329_v26  ;;  %1258 = vmatprep.mubr.msk.bf16.mxu0 %vm302_vm0, %v1320_v5 }
  0x2d   : > { %1268 = vmatprep.subr.bf16.mxu0 %v1331_v28 }
  0x30   : > { %1253 = vmatmul.mubr.msk.bf16.vlgmr.msra.gmra.mrb[8].mxu1 %vm302_vm0, %v368_v14 }
  0x31   : > { %1263 = vmatpush3.bf16.msra.mxu1 %v1330_v27  ;;  %1264 = vmatprep.mubr.msk.bf16.mxu1 %vm302_vm0, %v367_v18 }
  0x33   : > { %1259 = vmatmul.mubr.msk.bf16.vlgmr.msra.gmra.mrb[12].mxu0 %vm302_vm0, %v1321_v6 }
  0x34   : > { %1269 = vmatpush3.bf16.msra.mxu0 %v1331_v28  ;;  %1270 = vmatprep.mubr.msk.bf16.mxu0 %vm302_vm0, %v367_v18 }
  0x38   : > { %1265 = vmatmul.mubr.msk.bf16.vlgmr.msra.gmra.mrb[12].mxu1 %vm302_vm0, %v368_v14 }
  0x3b   : > { %1271 = vmatmul.mubr.msk.bf16.vlgmr.msra.gmra.mrb[16].mxu0 %vm302_vm0, %v368_v14 }
  0xec   : > { %v1224_v29 = vpop.f32.mrb[0].mxu0 }
  0xed   : > { %v343_v30 = vpop.f32.mrb[1].mxu0 }
  0xee   : > { %v1225_v31 = vpop.f32.mrb[2].mxu0 }
  0xef   : > { %v346_v32 = vpop.f32.mrb[3].mxu0 }
  0xf3   : > { %v1230_v33 = vpop.f32.mrb[0].mxu1 }
  0xf4   : > { %v425_v34 = vadd.f32 %v1230_v33, %v1224_v29  ;;  %v416_v35 = vpop.f32.mrb[1].mxu1 }
  0xf5   : > { %v417_v36 = vadd.f32 %v416_v35, %v343_v30  ;;  %v1231_v37 = vpop.f32.mrb[2].mxu1 }
  0xf6   : > { %v419_v38 = vpop.f32.mrb[3].mxu1  ;;  %v1236_v40 = vpop.f32.mrb[4].mxu0 }
  0xf7   : > { %v420_v39 = vadd.f32 %v419_v38, %v346_v32  ;;  %v517_v41 = vadd.f32 %v1236_v40, %v425_v34  ;;  %v501_v42 = vpop.f32.mrb[5].mxu0 }
  0xf8   : > { %v515_v43 = vadd.f32 %v501_v42, %v417_v36  ;;  %v1237_v44 = vpop.f32.mrb[6].mxu0 }
  0xf9   : > { %v504_v45 = vpop.f32.mrb[7].mxu0 }
  0xfa   : > { %v516_v48 = vadd.f32 %v504_v45, %v420_v39  ;;  %v1156_v39 = vld [vmem:[%s1499_s23 + $0x20] sm:$0x1] }
  0xfb   : > { %v1242_v46 = vpop.f32.mrb[4].mxu1 }
  0xfc   : > { %v581_v49 = vadd.f32 %v1242_v46, %v517_v41  ;;  %v565_v50 = vpop.f32.mrb[5].mxu1 }
  0xfd   : > { %v579_v51 = vadd.f32 %v565_v50, %v515_v43  ;;  %v1243_v52 = vpop.f32.mrb[6].mxu1 }
  0xfe   : > { %v821_v53 = vadd.f32 %v1494_v47, %v581_v49  ;;  %v568_v54 = vpop.f32.mrb[7].mxu1  ;;  %v1248_v58 = vpop.f32.mrb[8].mxu0  ;;  %v1166_v52 = vld [vmem:[%s1499_s23 + $0x2c] sm:$0x1] }
  0xff   : > { %v819_v55 = vadd.f32 %v1494_v47, %v579_v51  ;;  %v580_v56 = vadd.f32 %v568_v54, %v516_v48  ;;  %v628_v61 = vpop.f32.mrb[9].mxu0 }
 0x100   : > { %v824_v57 = vmax.f32 %v821_v53, 0.0  ;;  %v1249_v0 = vpop.f32.mrb[10].mxu0 }
 0x101   : > { %v820_v62 = vadd.f32 %v1494_v47, %v580_v56  ;;  %v822_v1 = vmax.f32 %v819_v55, 0.0  ;;  %v631_v3 = vpop.f32.mrb[11].mxu0 }
 0x102   : > { %v1172_v63 = vpack.c.bf16 %v824_v57, %v824_v57 }
 0x103   : > { %v823_v2 = vmax.f32 %v820_v62, 0.0  ;;  %v1254_v4 = vpop.f32.mrb[8].mxu1 }
 0x104   : > { %v844_v5 = vsel %vm1503_vm4, %v1172_v63, %v843_v60  ;;  %v691_v6 = vadd.f32 %v1254_v4, %v1248_v58  ;;  %v682_v7 = vpop.f32.mrb[9].mxu1 }
 0x105   : > { %845 = vst [vmem:[%s1499_s23 + $0x8] sm:$0x1] %v844_v5  ;;  %v1185_v8 = vpack.c.bf16 %v823_v2, %v822_v1  ;;  %v683_v9 = vadd.f32 %v682_v7, %v628_v61  ;;  %v1255_v10 = vpop.f32.mrb[10].mxu1 }
 0x106   : > { %v848_v11 = vadd.f32 %v1494_v47, %v691_v6  ;;  %v685_v12 = vpop.f32.mrb[11].mxu1  ;;  %v1260_v16 = vpop.f32.mrb[12].mxu0 }
 0x107   : > { %1186 = vst [vmem:[%s1499_s23] sm:$0xff] %v1185_v8   ;;  %v846_v13 = vadd.f32 %v1494_v47, %v683_v9  ;;  %v686_v14 = vadd.f32 %v685_v12, %v631_v3  ;;  %v742_v19 = vpop.f32.mrb[13].mxu0 }
 0x108   : > { %v851_v15 = vmax.f32 %v848_v11, 0.0  ;;  %v1261_v22 = vpop.f32.mrb[14].mxu0 }
 0x109   : > { %v849_v18 = vmax.f32 %v846_v13, 0.0  ;;  %v847_v20 = vadd.f32 %v1494_v47, %v686_v14  ;;  %v745_v25 = vpop.f32.mrb[15].mxu0 }
 0x10a   : > { %v1175_v21 = vpack.c.bf16 %v851_v15, %v851_v15 }
 0x10b   : > { %v1173_v23 = vpack.c.bf16 %v849_v18, %v849_v18  ;;  %v850_v24 = vmax.f32 %v847_v20, 0.0  ;;  %v1266_v26 = vpop.f32.mrb[12].mxu1 }
 0x10c   : > { %v869_v27 = vsel %vm1503_vm4, %v1175_v21, %v1149_v17  ;;  %v805_v28 = vadd.f32 %v1266_v26, %v1260_v16  ;;  %v796_v29 = vpop.f32.mrb[13].mxu1 }
 0x10d   : > { %1150 = vst [vmem:[%s1499_s23 + $0x14] sm:$0x1] %v869_v27  ;;  %1147 = vst [vmem:[%s1499_s23 + $0xc] sm:$0xf] %v1173_v23  ;;  %v1174_v30 = vpack.c.bf16 %v850_v24, %v850_v24  ;;  %v797_v31 = vadd.f32 %v796_v29, %v742_v19  ;;  %v1267_v32 = vpop.f32.mrb[14].mxu1 }
 0x10e   : > { %v873_v33 = vadd.f32 %v1494_v47, %v805_v28  ;;  %v799_v34 = vpop.f32.mrb[15].mxu1  ;;  %v1272_v38 = vpop.f32.mrb[16].mxu0 }
 0x10f   : > { %1148 = vst [vmem:[%s1499_s23 + $0x10] sm:$0xf] %v1174_v30  ;;  %v871_v35 = vadd.f32 %v1494_v47, %v797_v31  ;;  %v800_v36 = vadd.f32 %v799_v34, %v745_v25  ;;  %v945_v40 = vadd.f32 %v1272_v38, %v1494_v47  ;;  %v936_v41 = vpop.f32.mrb[17].mxu0 }
 0x110   : > { %v876_v37 = vmax.f32 %v873_v33, 0.0  ;;  %v937_v44 = vadd.f32 %v1494_v47, %v936_v41  ;;  %v1273_v45 = vpop.f32.mrb[18].mxu0 }
 0x111   : > { %v872_v42 = vadd.f32 %v1494_v47, %v800_v36  ;;  %v874_v46 = vmax.f32 %v871_v35, 0.0  ;;  %v952_v48 = vmax.f32 %v945_v40, 0.0  ;;  %v939_v50 = vpop.f32.mrb[19].mxu0 }
 0x112   : > { %v1178_v43 = vpack.c.bf16 %v876_v37, %v876_v37  ;;  %v950_v53 = vmax.f32 %v937_v44, 0.0  ;;  %v940_v54 = vadd.f32 %v1494_v47, %v939_v50 }
 0x113   : > { %v875_v49 = vmax.f32 %v872_v42, 0.0  ;;  %v1181_v55 = vpack.c.bf16 %v952_v48, %v952_v48 }
 0x114   : > { %v894_v51 = vsel %vm1503_vm4, %v1178_v43, %v1156_v39  ;;  %v1179_v57 = vpack.c.bf16 %v950_v53, %v950_v53  ;;  %v951_v58 = vmax.f32 %v940_v54, 0.0 }
 0x115   : > { %1157 = vst [vmem:[%s1499_s23 + $0x20] sm:$0x1] %v894_v51  ;;  %v1190_v56 = vpack.c.bf16 %v875_v49, %v874_v46  ;;  %v970_v60 = vsel %vm1503_vm4, %v1181_v55, %v1166_v52 }
 0x116   : > { %1167 = vst [vmem:[%s1499_s23 + $0x2c] sm:$0x1] %v970_v60  ;;  %1164 = vst [vmem:[%s1499_s23 + $0x24] sm:$0xf] %v1179_v57  ;;  %v1180_v61 = vpack.c.bf16 %v951_v58, %v951_v58 }
 0x117   : > { %1192 = vst [vmem:[%s1499_s23 + $0x18] sm:$0xff] %v1190_v56  }
 0x118   : > { %1165 = vst [vmem:[%s1499_s23 + $0x28] sm:$0xf] %v1180_v61 }
 0x119 PF: > { %s14_s19 = sadd.s32 1, %s1370_s19   ;;  %s1561_s15 = smov %s1362_s17 }
 0x11a   : > { %p11_p9 = scmp.ge.s32.totalorder %s14_s19, 36   ;;  %s1562_s16 = smov %s1366_s18 }
 0x11b   : > { %s1563_s17 = smov %s1566_s20  ;;  %s1564_s18 = smov %s1570_s21 }
 0x11c   :  { %13 = sbr.rel (!%p11_p9) target bundleno = 3 (0x3), region = 80 }

</bundles_post_ra>
